<compile_context>
chip_gen: v7x
topology: tpu7x:2x2x1
jax: 0.10.0
libtpu: 0.0.40
codegen_flags: <defaults>
</compile_context>

<pallas_src>
from functools import partial

import jax
import jax.numpy as jnp
from jax.experimental import pallas as pl
from jax.experimental.pallas import tpu as pltpu


def _round_up(v, m):
    return (v + m - 1) // m * m


def _mtl_kernel(x_ref, w1_ref, b1_ref, w2_ref, b2_ref, o_ref, acc_ref):
    """Fused trunk(+K-accum) -> bias -> ReLU -> head -> bias."""
    k = pl.program_id(1)

    @pl.when(k == 0)
    def _():
        acc_ref[...] = jnp.zeros_like(acc_ref)

    # Trunk partial product for this K slab (bf16 MXU operands, f32 accum).
    acc_ref[...] += jnp.dot(x_ref[...], w1_ref[...],
                            preferred_element_type=jnp.float32)

    @pl.when(k == pl.num_programs(1) - 1)
    def _():
        h = jnp.maximum(acc_ref[...] + b1_ref[...], 0.0)           # trunk bias + ReLU
        y = jnp.dot(h.astype(jnp.bfloat16), w2_ref[...],
                    preferred_element_type=jnp.float32) + b2_ref[...]
        o_ref[...] = y.astype(o_ref.dtype)


@partial(jax.jit, static_argnames=("block_m", "tk", "d_out"))
def _multi_task_forward(x, w1p, b1p, w2p, b2p, *, block_m, tk, d_out):
    B, D_in = x.shape
    Dp, Hp = w1p.shape
    Op = w2p.shape[1]

    # Batch tile: multiple of 16 (bf16 sublane tile), capped by block_m.
    tm = min(block_m, _round_up(B, 16))
    Bp = _round_up(B, tm)
    n_b = Bp // tm
    n_k = Dp // tk

    # Per-call staging of the activation only: fused pad of the bf16 cast,
    # skipped entirely when the shapes already align.
    xb = x.astype(jnp.bfloat16)
    if (Bp, Dp) != (B, D_in):
        xb = jnp.pad(xb, ((0, Bp - B), (0, Dp - D_in)))

    out_dtype = x.dtype
    out_bytes = jnp.dtype(out_dtype).itemsize

    # VMEM plan: invariants single-buffered, streamed blocks double-buffered.
    w1_bufs = 1 if n_k == 1 else 2
    vmem_bytes = (
        w1_bufs * tk * Hp * 2            # trunk weight block(s), bf16
        + Hp * Op * 2 + Hp * 4 + Op * 4  # head weight + biases (single-buffered)
        + 2 * tm * tk * 2                # x double buffer, bf16
        + 2 * tm * Op * out_bytes        # output double buffer
        + tm * Hp * 4                    # f32 accumulator scratch
    )
    vmem_limit = min(max(int(vmem_bytes * 1.5) + (2 << 20), 32 << 20), 64 << 20)

    # Trunk weights: VMEM-resident (single buffer) when there is no K split,
    # streamed (default double buffer) otherwise.
    if n_k == 1:
        w1_spec = pl.BlockSpec((tk, Hp), lambda i, k: (k, 0),
                               pipeline_mode=pl.Buffered(1))
    else:
        w1_spec = pl.BlockSpec((tk, Hp), lambda i, k: (k, 0))

    grid_spec = pltpu.PrefetchScalarGridSpec(
        num_scalar_prefetch=0,
        grid=(n_b, n_k),
        in_specs=[
            # x: pipelined (batch, K) tiles
            pl.BlockSpec((tm, tk), lambda i, k: (i, k)),
            w1_spec,
            # invariant bias / head weight / head bias: single-buffered
            pl.BlockSpec((1, Hp), lambda i, k: (0, 0),
                         pipeline_mode=pl.Buffered(1)),
            pl.BlockSpec((Hp, Op), lambda i, k: (0, 0),
                         pipeline_mode=pl.Buffered(1)),
            pl.BlockSpec((1, Op), lambda i, k: (0, 0),
                         pipeline_mode=pl.Buffered(1)),
        ],
        out_specs=pl.BlockSpec((tm, Op), lambda i, k: (i, 0)),
        scratch_shapes=[pltpu.VMEM((tm, Hp), jnp.float32)],
    )

    flops = 2 * Bp * (Dp * Hp + Hp * Op)
    bytes_accessed = (
        Bp * Dp * 2                                    # x
        + Dp * Hp * 2 * (1 if n_k == 1 else n_b)       # trunk weights
        + Hp * Op * 2 + (Hp + Op) * 4                  # head + biases
        + Bp * Op * out_bytes                          # output
    )

    out_padded = pl.pallas_call(
        _mtl_kernel,
        out_shape=jax.ShapeDtypeStruct((Bp, Op), out_dtype),
        grid_spec=grid_spec,
        compiler_params=pltpu.CompilerParams(
            dimension_semantics=("parallel", "arbitrary"),
            vmem_limit_bytes=vmem_limit),
        cost_estimate=pl.CostEstimate(
            flops=flops, transcendentals=0, bytes_accessed=bytes_accessed),
    )(xb, w1p, b1p, w2p, b2p)

    return out_padded[:B, :d_out]


class MultiTaskWrapper:
    """Pallas analogue of MultiTaskWrapper(model, task_idx=0).

    The multi-task MLP parameters are padded / bf16-cast ONCE here, and the
    head for the (construction-time static) task_idx is selected here, so the
    per-call path touches only the activation and the single selected head.
    """

    def __init__(self, w1, b1, w2_stack, b2_stack, task_idx=0, *,
                 block_m=256, block_k=None, max_resident_trunk_bytes=24 << 20):
        D_in, H = w1.shape
        T, H2, D_out = w2_stack.shape
        assert H2 == H, "head input dim must match trunk output dim"
        task_idx = int(task_idx)
        if not (0 <= task_idx < T):
            raise ValueError(f"task_idx {task_idx} out of range [0, {T})")

        # Lane-dense padding: all lane dims to multiples of 128.
        Dp = _round_up(D_in, 128)
        Hp = _round_up(H, 128)
        Op = _round_up(D_out, 128)

        # K-tiling of D_in only when the trunk block would not comfortably be
        # VMEM-resident (important on v7x: 64 MiB per TensorCore).
        if block_k is not None:
            tk = int(block_k)
            Dp = _round_up(Dp, tk)
        elif Dp * Hp * 2 <= max_resident_trunk_bytes:
            tk = Dp
        else:
            tk = 512
            Dp = _round_up(Dp, tk)

        # One-time pad + cast: bf16 MXU operands, f32 biases.
        w1p = (jnp.zeros((Dp, Hp), jnp.bfloat16)
               .at[:D_in, :H].set(w1.astype(jnp.bfloat16)))
        b1p = (jnp.zeros((1, Hp), jnp.float32)
               .at[:, :H].set(jnp.reshape(b1, (1, H)).astype(jnp.float32)))
        head_w = w2_stack[task_idx]
        head_b = jnp.reshape(b2_stack[task_idx], (1, D_out))
        w2p = (jnp.zeros((Hp, Op), jnp.bfloat16)
               .at[:H, :D_out].set(head_w.astype(jnp.bfloat16)))
        b2p = (jnp.zeros((1, Op), jnp.float32)
               .at[:, :D_out].set(head_b.astype(jnp.float32)))

        self._params = (w1p, b1p, w2p, b2p)
        self._tk = tk
        self._d_out = D_out
        self._block_m = int(block_m)

    def __call__(self, x):
        w1p, b1p, w2p, b2p = self._params
        return _multi_task_forward(x, w1p, b1p, w2p, b2p,
                                   block_m=self._block_m, tk=self._tk,
                                   d_out=self._d_out)


def _reference(x, w1, b1, w2_stack, b2_stack, task_idx):
    h = jnp.maximum(x @ w1 + jnp.reshape(b1, (1, -1)), 0.0)
    return h @ w2_stack[task_idx] + jnp.reshape(b2_stack[task_idx], (1, -1))


if __name__ == "__main__":
    # Small shapes consistent with a generic multi-task MLP forward.
    B, D_in, H, D_out, T = 48, 256, 64, 48, 3
    TASK_IDX = 0  # MultiTaskWrapper default

    key = jax.random.PRNGKey(0)
    kx, k1, k2, k3, k4 = jax.random.split(key, 5)

    x = jax.random.normal(kx, (B, D_in), dtype=jnp.float32)
    w1 = jax.random.normal(k1, (D_in, H), dtype=jnp.float32) * 0.1
    b1 = jax.random.normal(k2, (1, H), dtype=jnp.float32) * 0.1
    w2 = jax.random.normal(k3, (T, H, D_out), dtype=jnp.float32) * 0.1
    b2 = jax.random.normal(k4, (T, 1, D_out), dtype=jnp.float32) * 0.1

    ref = _reference(x, w1, b1, w2, b2, TASK_IDX)

    # 1) Resident-trunk path (n_k == 1), block_m=16 so the batch grid actually
    #    has several pipelined steps at this small size.
    model = MultiTaskWrapper(w1, b1, w2, b2, task_idx=TASK_IDX, block_m=16)
    out = jax.block_until_ready(model(x))
    assert out.shape == ref.shape, "shape mismatch vs reference"
    assert jnp.allclose(out, ref, atol=5e-2, rtol=5e-2), "mismatch vs reference"

    # 2) Force the K-grid (D_in streaming) path to exercise the accumulator
    #    scheme used for large D_in on v7x.
    model_k = MultiTaskWrapper(w1, b1, w2, b2, task_idx=TASK_IDX,
                               block_m=16, block_k=128)
    out_k = jax.block_until_ready(model_k(x))
    assert jnp.allclose(out_k, ref, atol=5e-2, rtol=5e-2), "K-grid mismatch vs reference"

    print("KERNEL_OK")
</pallas_src>

<mosaic_0001>
module attributes {stable_mosaic.version = 11 : i64} {
  func.func @_mtl_kernel(%arg0: i32, %arg1: i32, %arg2: memref<16x256xbf16, #tpu.memory_space<vmem>>, %arg3: memref<256x128xbf16, #tpu.memory_space<vmem>>, %arg4: memref<1x128xf32, #tpu.memory_space<vmem>>, %arg5: memref<128x128xbf16, #tpu.memory_space<vmem>>, %arg6: memref<1x128xf32, #tpu.memory_space<vmem>>, %arg7: memref<16x128xf32, #tpu.memory_space<vmem>>, %arg8: memref<16x128xf32, #tpu.memory_space<vmem>>) attributes {dimension_semantics = [#tpu.dimension_semantics<parallel>, #tpu.dimension_semantics<arbitrary>], iteration_bounds = array<i64: 3, 1>, scalar_prefetch = 0 : i64, scratch_operands = 1 : i64, tpu.core_type = #tpu.core_type<tc>, window_params = [{transform_indices = @transform_0, window_bounds = array<i64: 16, 256>}, {pipeline_mode = #tpu.pipeline_mode<synchronous>, transform_indices = @transform_1, window_bounds = array<i64: 256, 128>}, {pipeline_mode = #tpu.pipeline_mode<synchronous>, transform_indices = @transform_2, window_bounds = array<i64: 1, 128>}, {pipeline_mode = #tpu.pipeline_mode<synchronous>, transform_indices = @transform_3, window_bounds = array<i64: 128, 128>}, {pipeline_mode = #tpu.pipeline_mode<synchronous>, transform_indices = @transform_4, window_bounds = array<i64: 1, 128>}, {transform_indices = @transform_5, window_bounds = array<i64: 16, 128>}]} {
    %c0_i32 = arith.constant 0 : i32
    %0 = arith.cmpi eq, %arg1, %c0_i32 : i32
    %1 = arith.extui %0 : i1 to i32
    %c0_i32_0 = arith.constant 0 : i32
    %2 = arith.cmpi ne, %1, %c0_i32_0 : i32
    scf.if %2 {
      %cst_10 = arith.constant 0.000000e+00 : f32
      %12 = vector.broadcast %cst_10 : f32 to vector<16x128xf32>
      %c0_11 = arith.constant 0 : index
      %c0_12 = arith.constant 0 : index
      %13 = vector.load %arg8[%c0_11, %c0_12] : memref<16x128xf32, #tpu.memory_space<vmem>>, vector<16x128xf32>
      tpu.vector_store %arg8[%c0_11, %c0_12], %12 {strides = array<i32>} : memref<16x128xf32, #tpu.memory_space<vmem>>, vector<16x128xf32>,
    } else {
    }
    %c0 = arith.constant 0 : index
    %c0_1 = arith.constant 0 : index
    %3 = vector.load %arg8[%c0, %c0_1] : memref<16x128xf32, #tpu.memory_space<vmem>>, vector<16x128xf32>
    %c0_2 = arith.constant 0 : index
    %c0_3 = arith.constant 0 : index
    %4 = vector.load %arg2[%c0_2, %c0_3] : memref<16x256xbf16, #tpu.memory_space<vmem>>, vector<16x256xbf16>
    %c0_4 = arith.constant 0 : index
    %c0_5 = arith.constant 0 : index
    %5 = vector.load %arg3[%c0_4, %c0_5] : memref<256x128xbf16, #tpu.memory_space<vmem>>, vector<256x128xbf16>
    %cst = arith.constant dense<0.000000e+00> : vector<16x128xf32>
    %6 = tpu.matmul %4, %5, %cst {dimension_numbers = #tpu.dot_dimension_numbers<[1], [0], [0], [1], [0, 0, 1, 1], [], []>} : vector<16x256xbf16>, vector<256x128xbf16>, vector<16x128xf32> -> vector<16x128xf32>
    %7 = arith.addf %3, %6 : vector<16x128xf32>
    %c0_6 = arith.constant 0 : index
    %c0_7 = arith.constant 0 : index
    %8 = vector.load %arg8[%c0_6, %c0_7] : memref<16x128xf32, #tpu.memory_space<vmem>>, vector<16x128xf32>
    tpu.vector_store %arg8[%c0_6, %c0_7], %7 {strides = array<i32>} : memref<16x128xf32, #tpu.memory_space<vmem>>, vector<16x128xf32>,
    %c0_i32_8 = arith.constant 0 : i32
    %9 = arith.cmpi eq, %arg1, %c0_i32_8 : i32
    %10 = arith.extui %9 : i1 to i32
    %c0_i32_9 = arith.constant 0 : i32
    %11 = arith.cmpi ne, %10, %c0_i32_9 : i32
    scf.if %11 {
      %c0_10 = arith.constant 0 : index
      %c0_11 = arith.constant 0 : index
      %12 = vector.load %arg8[%c0_10, %c0_11] : memref<16x128xf32, #tpu.memory_space<vmem>>, vector<16x128xf32>
      %c0_12 = arith.constant 0 : index
      %c0_13 = arith.constant 0 : index
      %13 = vector.load %arg4[%c0_12, %c0_13] : memref<1x128xf32, #tpu.memory_space<vmem>>, vector<1x128xf32>
      %14 = vector.broadcast %13 : vector<1x128xf32> to vector<16x128xf32>
      %15 = arith.addf %12, %14 : vector<16x128xf32>
      %cst_14 = arith.constant 0.000000e+00 : f32
      %16 = vector.broadcast %cst_14 : f32 to vector<16x128xf32>
      %17 = arith.maximumf %15, %16 : vector<16x128xf32>
      %18 = arith.truncf %17 : vector<16x128xf32> to vector<16x128xbf16>
      %c0_15 = arith.constant 0 : index
      %c0_16 = arith.constant 0 : index
      %19 = vector.load %arg5[%c0_15, %c0_16] : memref<128x128xbf16, #tpu.memory_space<vmem>>, vector<128x128xbf16>
      %cst_17 = arith.constant dense<0.000000e+00> : vector<16x128xf32>
      %20 = tpu.matmul %18, %19, %cst_17 {dimension_numbers = #tpu.dot_dimension_numbers<[1], [0], [0], [1], [0, 0, 1, 1], [], []>} : vector<16x128xbf16>, vector<128x128xbf16>, vector<16x128xf32> -> vector<16x128xf32>
      %c0_18 = arith.constant 0 : index
      %c0_19 = arith.constant 0 : index
      %21 = vector.load %arg6[%c0_18, %c0_19] : memref<1x128xf32, #tpu.memory_space<vmem>>, vector<1x128xf32>
      %22 = vector.broadcast %21 : vector<1x128xf32> to vector<16x128xf32>
      %23 = arith.addf %20, %22 : vector<16x128xf32>
      %c0_20 = arith.constant 0 : index
      %c0_21 = arith.constant 0 : index
      %24 = vector.load %arg7[%c0_20, %c0_21] : memref<16x128xf32, #tpu.memory_space<vmem>>, vector<16x128xf32>
      tpu.vector_store %arg7[%c0_20, %c0_21], %23 {strides = array<i32>} : memref<16x128xf32, #tpu.memory_space<vmem>>, vector<16x128xf32>,
    } else {
    }
    return
  }
  func.func @transform_0(%arg0: i32, %arg1: i32) -> (i32, i32) {
    %c0_i32 = arith.constant 0 : i32
    return %arg0, %arg1 : i32, i32
  }
  func.func @transform_1(%arg0: i32, %arg1: i32) -> (i32, i32) {
    %c0_i32 = arith.constant 0 : i32
    %c0_i32_0 = arith.constant 0 : i32
    return %arg1, %c0_i32 : i32, i32
  }
  func.func @transform_2(%arg0: i32, %arg1: i32) -> (i32, i32) {
    %c0_i32 = arith.constant 0 : i32
    %c0_i32_0 = arith.constant 0 : i32
    %c0_i32_1 = arith.constant 0 : i32
    return %c0_i32, %c0_i32_0 : i32, i32
  }
  func.func @transform_3(%arg0: i32, %arg1: i32) -> (i32, i32) {
    %c0_i32 = arith.constant 0 : i32
    %c0_i32_0 = arith.constant 0 : i32
    %c0_i32_1 = arith.constant 0 : i32
    return %c0_i32, %c0_i32_0 : i32, i32
  }
  func.func @transform_4(%arg0: i32, %arg1: i32) -> (i32, i32) {
    %c0_i32 = arith.constant 0 : i32
    %c0_i32_0 = arith.constant 0 : i32
    %c0_i32_1 = arith.constant 0 : i32
    return %c0_i32, %c0_i32_0 : i32, i32
  }
  func.func @transform_5(%arg0: i32, %arg1: i32) -> (i32, i32) {
    %c0_i32 = arith.constant 0 : i32
    %c0_i32_0 = arith.constant 0 : i32
    return %arg0, %c0_i32 : i32, i32
  }
}

</mosaic_0001>

<bundles_post_ra>
// kernel: _multi_task_forward.1
= control target key start
LH: loop header
LB: loop body
LE: loop exit
PB: predicated region body
PF: predicated region fallthrough
CT: control target
= control target key end

     0   :  { %10 = vsyncpa [#allocation4], 0  ;;  %s1298_s0 = inlined_call_operand.vmem [shape: bf16[48,256], index: 0, kind: input, shape index: {}]   ;;  %s1299_s1 = inlined_call_operand.vmem [shape: bf16[256,128], index: 1, kind: input, shape index: {}]   ;;  %s1300_s2 = inlined_call_operand.vmem [shape: f32[1,128], index: 2, kind: input, shape index: {}]   ;;  %s1301_s3 = inlined_call_operand.hbm [shape: bf16[128,128], index: 3, kind: input, shape index: {}]   ;;  %s1302_s4 = inlined_call_operand.vmem [shape: f32[1,128], index: 4, kind: input, shape index: {}]   ;;  %s1303_s5 = inlined_call_operand.hbm [shape: f32[48,128], index: 5, kind: output, shape index: {}]  }
   0x1   :  { %11 = vsyncpa [#allocation5], 0 }
   0x2   :  { %13 = vsyncpa [#allocation5 + $0x1], 0  ;;  %s1083_s18 = smov 0   ;;  %s1085_s19 = smov 0  }
   0x3   :  { %s1087_s20 = smov 0   ;;  %s1089_s21 = smov 0  }
   0x4   :  { %s1091_s22 = smov 0   ;;  %s1093_s23 = smov 0  }
   0x5 LB: > { %s736_s24 = sadd.s32 4294967295, %s1043_s23   ;;  %s737_s25 = sadd.s32 4294967294, %s1043_s23   ;;  %s1043_s23 = sphi %s1093_s23, %s19_s23   ;;  %s1039_s22 = sphi %s1091_s22, %s1321_s22   ;;  %s1035_s21 = sphi %s1089_s21, %s1320_s21   ;;  %s1031_s20 = sphi %s1087_s20, %s1319_s20   ;;  %s1027_s19 = sphi %s1085_s19, %s1318_s19   ;;  %s1023_s18 = sphi %s1083_s18, %s1317_s18  }
   0x6   : > { %s31_s26 = sadd.s32 1, %s1039_s22  ;;  %s155_s27 = sadd.s32 1, %s1031_s20 }
   0x7   : > { %p33_p0 = scmp.ge.s32.totalorder %s31_s26, 3  ;;  %p165_p1 = scmp.ne.s32.totalorder %s1031_s20, %s1027_s19 }
   0x8   : > { %p166_p2 = scmp.eq.s32.totalorder %s736_s24, 2  ;;  %p171_p3 = scmp.ne.s32.totalorder %s1027_s19, %s1023_s18 }
   0x9   : > { %s1323_s26 = smov (%p33_p0, %s31_s26), 0  ;;  %p172_p5 = scmp.eq.s32.totalorder %s737_s25, 2 }
   0xa   : > { %p1123_p4 = por %p166_p2, %p165_p1  ;;  %s152_s29 = ssub.s32 %s1039_s22, %s1323_s26 }
   0xb   : > { %p738_p6 = scmp.ge.s32.totalorder %s1043_s23, 1  ;;  %p153_p7 = scmp.eq.s32.totalorder %s152_s29, 0 }
   0xc   : > { %s1308_s28 = scalar_select %p1123_p4, 1, 0 }
   0xd   : > { %p1130_p8 = por %p172_p5, %p171_p3  ;;  %p179_p9 = scmp.lt.s32.totalorder %s1043_s23, 4 }
   0xe   : > { %s1136_s6 = scalar_select %p153_p7, %s1031_s20, %s155_s27  }
   0xf   : > { %s1309_s30 = scalar_select %p1130_p8, 1, 0 }
  0x10   : > { %p1138_p10 = pnand %p738_p6, %p179_p9  ;;  %p1142_p11 = scmp.eq.s32.totalorder %s736_s24, 0 }
  0x11   : > { %s1045_s9 = smov [#allocation3]   ;;  %s933_s14 = scalar_lea.hbm %s1301_s3, 1024 }
  0x12   : > { %s1310_s7 = scalar_select %p1138_p10, 1, 0 }
  0x13   : > { %s1311_s8 = scalar_select %p1142_p11, 1, 0 }
  0x14   : > { %p840_p12 = pneg %p1138_p10  ;;  %s203_s10 = sshll.u32 %s1045_s9, 4  ;;  %s204_s10 = int_to_ptr.vmem [resolvable:$true] %s203_s10 }
  0x15   : > { %p934_p0 = scmp.ne.s32.totalorder %s1301_s3, %s933_s14  ;;  %p940_p5 = scmp.lt.u32.totalorder %s933_s14, %s1301_s3 }
  0x16   : > { %p1150_p13 = pnand %p1142_p11, %p840_p12 }
  0x18   : > { %p935_p1 = pneg %p1150_p13 }
  0x1a   : > { %p936_p2 = pnand %p935_p1, %p934_p0 }
  0x1c   : > { %p937_p3 = pneg %p936_p2 }
  0x1e   : > { %p942_p6 = pnand %p940_p5, %p937_p3 }
  0x20   : > { %945 = shalt.err (!%p942_p6)
}
  0x21   : > { %s946_s25 = scalar_lea.vmem %s204_s10, 1024  ;;  %p954_p8 = scmp.lt.s32.totalorder %s204_s10, %s204_s10 }
  0x22   : > { %p947_p7 = scmp.ne.s32.totalorder %s204_s10, %s946_s25  ;;  %p955_p4 = scmp.lt.s32.totalorder %s946_s25, %s946_s25 }
  0x24   : > { %p949_p9 = pnand %p947_p7, %p935_p1  ;;  %p956_p11 = por %p955_p4, %p954_p8 }
  0x26   : > { %p950_p12 = pneg %p949_p9 }
  0x28   : > { %p957_p10 = pnand %p956_p11, %p950_p12 }
  0x2a   : > { %960 = shalt.err (!%p957_p10)
}
  0x2b   : > { %s1046_s27 = smov 64   ;;  %s1047_s29 = smov 4  }
  0x2c   : > { %843 = dma.hbm_to_vmem [thread:$0]  (!%p1150_p13), %s1301_s3, 1024, %s204_s10, [#allocation4], %s1046_s27, %s1046_s27, %s1047_s29  }
  0x2d   : > { %p1313_p0 = scmp.ne.s32.totalorder %s1310_s7, 0 }
  0x2e   : > { %p1314_p2 = scmp.ne.s32.totalorder (!%p1313_p0), %s1311_s8, 0 }
  0x2f   : > { %237 = sbr.rel (%p1313_p0) target bundleno = 542 (0x21e), region = 40 }
  0x36   : > { %1014 = dma.done.wait (%p1314_p2), [#allocation4], 1024  }
  0x37   : > { %1016 = vsyncadd (%p1314_p2), [#allocation4], 4294966272  ;;  %v1048_v0 = vmov 0.0   ;;  %v906_v1 = vld [vmem:[%s1299_s1 + $0x40] sm:$0xff]   ;;  %s745_s11 = sshll.u32 %s1035_s21, 1  ;;  %v908_v3 = vld [vmem:[%s1299_s1 + $0x48] sm:$0xff]  }
  0x38   : > { %814 = vmatprep.subr.bf16.mxu1 %v1048_v0  ;;  %v907_v2 = vld [vmem:[%s1299_s1] sm:$0xff]   ;;  %783 = vmatprep.subr.bf16.mxu0 %v906_v1  ;;  %v909_v4 = vld [vmem:[%s1299_s1 + $0x8] sm:$0xff]   ;;  %p277_p4 = scmp.lt.s32.totalorder %s745_s11, 5  ;;  %v910_v5 = vld [vmem:[%s1299_s1 + $0x50] sm:$0xff]   ;;  %vm1049_vm0 = vmmov 0   ;;  %s272_s25 = sand.u32 1, %s1027_s19  }
  0x39   : > { %784 = vmatpush3.bf16.msra.mxu0 %v907_v2  ;;  %v911_v6 = vld [vmem:[%s1299_s1 + $0x10] sm:$0xff]   ;;  %v912_v7 = vld [vmem:[%s1299_s1 + $0x58] sm:$0xff]   ;;  %v914_v9 = vld [vmem:[%s1299_s1 + $0x60] sm:$0xff]   ;;  %830 = vmatprep.mubr.msk.bf16.mxu1 %vm1049_vm0, %v1048_v0  ;;  %s744_s27 = sshll.u32 %s272_s25, 4  ;;  %s782_s13 = sshll.u32 %s1035_s21, 8 }
  0x3a   : > { %785 = vmatprep.subr.bf16.mxu0 %v908_v3  ;;  %s1325_s11 = smov (!%p277_p4, %s745_s11), 5  ;;  %v913_v8 = vld [vmem:[%s1299_s1 + $0x18] sm:$0xff]   ;;  %v915_v10 = vld [vmem:[%s1299_s1 + $0x20] sm:$0xff]   ;;  %v916_v11 = vld [vmem:[%s1299_s1 + $0x68] sm:$0xff]   ;;  %s274_s9 = scalar_lea.vmem [#allocation6], %s744_s27 }
  0x3b   : > { %s781_s15 = sshll.u32 %s1325_s11, 3  ;;  %v917_v12 = vld [vmem:[%s1299_s1 + $0x28] sm:$0xff]   ;;  %v925_v14 = vld [vmem:[#allocation3] sm:$0xff]   ;;  %v926_v16 = vld [vmem:[#allocation3 + $0x8] sm:$0xff]   ;;  %s633_s12 = sshll.u32 %s274_s9, 4  ;;  %s1245_s12 = int_to_ptr.vmem [resolvable:$true] %s633_s12 }
  0x3c   : > { %s284_s17 = scalar_lea.vmem %s1298_s0, %s781_s15  ;;  %v918_v15 = vld [vmem:[%s1299_s1 + $0x70] sm:$0xff]   ;;  %815 = vmatpush3.bf16.msra.mxu1 %v925_v14  ;;  %v920_v18 = vld [vmem:[%s1299_s1 + $0x78] sm:$0xff]   ;;  %v927_v19 = vld [vmem:[#allocation3 + $0x10] sm:$0xff]   ;;  %s1250_s10 = scalar_lea.hbm %s1303_s5, %s782_s13 }
  0x3d   : > { %786 = vmatpush3.bf16.msra.mxu0 %v909_v4  ;;  %v924_v13 = vld [vmem:[%s284_s17 + $0x4] ss:$8 sps:$4 sm:$0xff]   ;;  %816 = vmatprep.subr.bf16.mxu1 %v1048_v0  ;;  %v919_v17 = vld [vmem:[%s1299_s1 + $0x30] sm:$0xff]   ;;  %v921_v20 = vld [vmem:[%s1299_s1 + $0x38] sm:$0xff]   ;;  %s1252_s7 = scalar_lea.sflag [#allocation5], %s272_s25  ;;  %s961_s21 = scalar_lea.vmem %s1245_s12, 256 }
  0x3e   : > { %787 = vmatprep.subr.bf16.mxu0 %v910_v5  ;;  %475 = vmatprep.mubr.bf16.mxu0 %v924_v13  ;;  %v928_v21 = vld [vmem:[#allocation3 + $0x18] sm:$0xff]   ;;  %v929_v23 = vld [vmem:[#allocation3 + $0x20] sm:$0xff]   ;;  %v930_v24 = vld [vmem:[#allocation3 + $0x28] sm:$0xff]   ;;  %p962_p8 = scmp.ne.s32.totalorder %s1245_s12, %s961_s21  ;;  %p1315_p10 = scmp.ne.s32.totalorder %s1308_s28, 0 }
  0x3f   : > { %v922_v22 = vld [vmem:[%s284_s17] ss:$8 sps:$4 sm:$0xff]   ;;  %s1050_s16 = smov [#allocation6]  }
  0x40   : > { %817 = vmatpush3.bf16.msra.mxu1 %v926_v16  ;;  %v931_v25 = vld [vmem:[#allocation3 + $0x30] sm:$0xff]   ;;  %v932_v26 = vld [vmem:[#allocation3 + $0x38] sm:$0xff]   ;;  %p963_p11 = pnand %p962_p8, %p1315_p10  ;;  %s965_s8 = sshll.u32 %s1050_s16, 4  ;;  %s966_s8 = int_to_ptr.vmem [resolvable:$false] %s965_s8 }
  0x41   : > { %788 = vmatpush3.bf16.msra.mxu0 %v911_v6  ;;  %818 = vmatprep.subr.bf16.mxu1 %v1048_v0  ;;  %v766_v29 = vld [vmem:[%s1300_s2] ss:$0 sm:$0xff]  ;;  %s967_s17 = scalar_lea.vmem %s966_s8, 512  ;;  %p968_p1 = scmp.lt.s32.totalorder %s1245_s12, %s966_s8 }
  0x42   : > { %789 = vmatprep.subr.bf16.mxu0 %v912_v7  ;;  %v767_v39 = vld [vmem:[%s1302_s4] ss:$0 sm:$0xff]  ;;  %p964_p13 = pneg %p963_p11  ;;  %p969_p3 = scmp.lt.s32.totalorder %s967_s17, %s961_s21 }
  0x44   : > { %819 = vmatpush3.bf16.msra.mxu1 %v927_v19  ;;  %p970_p5 = por %p969_p3, %p968_p1 }
  0x45   : > { %790 = vmatpush3.bf16.msra.mxu0 %v913_v8  ;;  %820 = vmatprep.subr.bf16.mxu1 %v1048_v0 }
  0x46   : > { %791 = vmatprep.subr.bf16.mxu0 %v914_v9  ;;  %p971_p6 = pnand %p970_p5, %p964_p13 }
  0x48   : > { %821 = vmatpush3.bf16.msra.mxu1 %v928_v21 }
  0x49   : > { %792 = vmatpush3.bf16.msra.mxu0 %v915_v10  ;;  %822 = vmatprep.subr.bf16.mxu1 %v1048_v0 }
  0x4a   : > { %793 = vmatprep.subr.bf16.mxu0 %v916_v11 }
  0x4c   : > { %823 = vmatpush3.bf16.msra.mxu1 %v929_v23 }
  0x4d   : > { %794 = vmatpush3.bf16.msra.mxu0 %v917_v12  ;;  %824 = vmatprep.subr.bf16.mxu1 %v1048_v0 }
  0x4e   : > { %795 = vmatprep.subr.bf16.mxu0 %v918_v15 }
  0x50   : > { %825 = vmatpush3.bf16.msra.mxu1 %v930_v24 }
  0x51   : > { %796 = vmatpush3.bf16.msra.mxu0 %v919_v17  ;;  %826 = vmatprep.subr.bf16.mxu1 %v1048_v0 }
  0x52   : > { %797 = vmatprep.subr.bf16.mxu0 %v920_v18 }
  0x54   : > { %827 = vmatpush3.bf16.msra.mxu1 %v931_v25 }
  0x55   : > { %798 = vmatpush3.bf16.msra.mxu0 %v921_v20  ;;  %828 = vmatprep.subr.bf16.mxu1 %v1048_v0 }
  0x58   : > { %476 = vmatmul.mubr.bf16.vlgmr.msra.gmra.mrb[0].mxu0 %v922_v22  ;;  %829 = vmatpush3.bf16.msra.mxu1 %v932_v26 }
 0x12b   : > { %v799_v27 = vpop.f32.mrb[0].mxu0 }
 0x12c   : > { %v800_v28 = vpop.f32.mrb[1].mxu0 }
 0x12d   : > { %v801_v30 = vadd.f32 %v800_v28, %v799_v27  ;;  %v802_v31 = vpop.f32.mrb[2].mxu0 }
 0x12e   : > { %v803_v32 = vpop.f32.mrb[3].mxu0 }
 0x12f   : > { %v500_v33 = vadd.f32 %v801_v30, %v766_v29  ;;  %v804_v34 = vadd.f32 %v803_v32, %v802_v31 }
 0x131   : > { %v501_v35 = vadd.f32 %v804_v34, %v766_v29  ;;  %v502_v36 = vmax.f32 %v500_v33, 0.0 }
 0x133   : > { %v503_v37 = vmax.f32 %v501_v35, 0.0 }
 0x135   : > { %v504_v38 = vpack.c.bf16 %v503_v37, %v502_v36 }
 0x137   : > { %831 = vmatmul.mubr.bf16.vlgmr.msra.gmra.mrb[0].mxu1 %v504_v38 }
 0x20a   : > { %v610_v40 = vpop.f32.mrb[0].mxu1 }
 0x20b   : > { %v611_v41 = vadd.f32 %v767_v39, %v610_v40  ;;  %v832_v42 = vpop.f32.mrb[1].mxu1 }
 0x20c   : > { %v613_v43 = vpop.f32.mrb[2].mxu1 }
 0x20d   : > { %617 = vst [vmem:[%s274_s9] sm:$0xff] %v611_v41  ;;  %v614_v44 = vadd.f32 %v767_v39, %v613_v43  ;;  %v833_v45 = vpop.f32.mrb[3].mxu1 }
 0x20f   : > { %618 = vst [vmem:[%s274_s9 + $0x8] sm:$0xff] %v614_v44 }
 0x210   : > { %974 = shalt.err (!%p971_p6)
}
 0x211   : > { %s975_s24 = scalar_lea.hbm %s1250_s10, 256  ;;  %s979_s29 = scalar_lea.hbm %s1303_s5, 768 }
 0x212   : > { %p976_p7 = scmp.ne.s32.totalorder %s1250_s10, %s975_s24  ;;  %p980_p0 = scmp.lt.u32.totalorder %s1250_s10, %s1303_s5 }
 0x213   : > { %p981_p2 = scmp.lt.u32.totalorder %s979_s29, %s975_s24  ;;  %p983_p8 = scmp.lt.u32.totalorder %s975_s24, %s1250_s10 }
 0x214   : > { %p977_p9 = pnand %p976_p7, %p1315_p10 }
 0x215   : > { %p982_p4 = por %p981_p2, %p980_p0 }
 0x216   : > { %p978_p12 = pneg %p977_p9 }
 0x217   : > { %p984_p11 = por %p983_p8, %p982_p4 }
 0x219   : > { %p985_p13 = pnand %p984_p11, %p978_p12 }
 0x21b   : > { %988 = shalt.err (!%p985_p13)
}
 0x21c   : > { %s1051_s13 = smov 128   ;;  %s1052_s14 = smov 8  }
 0x21d   : > { %838 = dma.vmem_to_hbm [thread:$0]  (%p1315_p10), %s1245_s12, 256, %s1250_s10, %s1252_s7, %s1051_s13, %s1051_s13, %s1052_s14  }
 0x21e PF: > { %p850_p1 = scmp.ge.s32.totalorder %s1043_s23, 2  ;;  %s648_s15 = sand.u32 1, %s1023_s18  }
 0x21f   : > { %p1316_p3 = scmp.ne.s32.totalorder %s1309_s30, 0  ;;  %s649_s21 = scalar_lea.sflag [#allocation5], %s648_s15 }
 0x221   : > { %p845_p5 = pnand %p850_p1, %p1316_p3 }
 0x223   : > { %1018 = dma.done.wait (!%p845_p5), %s649_s21, 256  }
 0x224   : > { %1020 = vsyncadd (!%p845_p5), %s649_s21, 4294967040  ;;  %s19_s23 = sadd.s32 1, %s1043_s23   ;;  %s1317_s18 = smov %s1027_s19 }
 0x225   : > { %p16_p6 = scmp.ge.s32.totalorder %s19_s23, 5   ;;  %s1318_s19 = smov %s1031_s20 }
 0x226   : > { %s1319_s20 = smov %s1136_s6  ;;  %s1320_s21 = smov %s1039_s22 }
 0x227   : > { %s1321_s22 = smov %s1323_s26  ;;  %18 = sbr.rel (!%p16_p6) target bundleno = 5 (0x5), region = 91 }
 0x22e   :  { %654 = vsyncpa [#allocation4], 1 }
 0x22f   :  { %656 = vsyncpa [#allocation4 + $0x1], 1 }
 0x230   :  { %657 = vsyncpa [#allocation5], 1 }
 0x231   :  { %659 = vsyncpa [#allocation5 + $0x1], 1 }

</bundles_post_ra>
